<compile_context>
chip_gen: v7x
topology: tpu7x:2x2x1
jax: 0.10.0
libtpu: 0.0.40
codegen_flags: <defaults>
</compile_context>

<pallas_src>
import jax
import jax.numpy as jnp
from jax.experimental import pallas as pl
from jax.experimental.pallas import tpu as pltpu


# --------------------------------------------------------------------------
# Kernel
# --------------------------------------------------------------------------
def _conv1x1_kernel(x_ref, w_ref, bias_ref, o_ref):
    # x_ref:    (Nb, Cin, hw_tile)   NCHW pixels of Nb batch elements
    # w_ref:    (Cout, Cin)          1x1-conv weight (same for all batches)
    # bias_ref: (Nb, Cout, 1)        per-batch f32 bias (condition folded in)
    # o_ref:    (Nb, Cout, hw_tile)
    w = w_ref[...]
    nb = x_ref.shape[0]
    for i in range(nb):  # static unroll; leading-dim indexing is a free view
        y = jnp.dot(w, x_ref[i], preferred_element_type=jnp.float32)  # (Cout, hw)
        o_ref[i] = (y + bias_ref[i]).astype(o_ref.dtype)              # lane bcast


# --------------------------------------------------------------------------
# Tile / VMEM selection
# --------------------------------------------------------------------------
def _vmem_limit_bytes():
    """Scoped-VMEM limit: ~3/4 of physical when queryable (96 MiB on v5e/v6e,
    48 MiB on v7x); falls back to a value safe on every generation."""
    try:
        phys = getattr(pltpu.get_tpu_info(), "vmem_capacity_bytes", None)
        if phys:
            return int(min(phys * 3 // 4, 96 * 1024 * 1024))
    except Exception:
        pass
    return 48 * 1024 * 1024  # <= 3/4 of v7x's 64 MiB physical VMEM


def _pick_tiles(N, Cin, Cout, hw_pad, itemsize, *, w_bytes, vmem_limit,
                target_bytes=1 << 20, max_hw_tile=32768):
    """Pick (Nb, hw_tile): batch-block size and lane-tile size.

    Each grid step should move >= ~1 MB of HBM traffic (amortizes the
    ~0.35 us/step pipeline overhead, saturates v7x and is harmless on
    v5e/v6e), stay within a conservative double-buffered VMEM budget, keep
    the lane dim a multiple of 128, and leave >= 2 parallel steps when
    possible (v7x has 2 TensorCores)."""
    per_lane = (Cin + Cout) * itemsize              # x read + out write per lane
    budget = max(4 << 20, min(24 << 20, vmem_limit // 2) - 4 * w_bytes)
    cap_lanes = max(128, (budget // (2 * per_lane)) // 128 * 128)
    hw_tile = max(128, min(hw_pad, max_hw_tile, cap_lanes))

    nb = 1
    if hw_tile >= hw_pad:                           # whole (padded) image in one tile
        step_bytes = hw_pad * per_lane
        nb_want = min(N,
                      max(1, target_bytes // max(1, step_bytes)),
                      max(1, budget // (2 * step_bytes)))
        for d in range(int(nb_want), 0, -1):        # largest divisor of N <= nb_want
            if N % d == 0:
                nb = d
                break

    n_hw = pl.cdiv(hw_pad, hw_tile)
    if (N // nb) * n_hw < 2:                        # keep both v7x TCs busy if possible
        if nb > 1:
            for d in range(max(1, nb // 2), 0, -1):
                if N % d == 0:
                    nb = d
                    break
        elif hw_pad >= 256:
            hw_tile = max(128, (pl.cdiv(hw_pad, 2) // 128) * 128)
    return nb, hw_tile


# --------------------------------------------------------------------------
# pallas_call wrapper: (N, Cin, HW_pad) @ (Cout, Cin)^T + bias_n
# --------------------------------------------------------------------------
def _conv1x1_nchw(x_flat, w, bias_n):
    """x_flat: (N, Cin, HW_pad) with HW_pad % 128 == 0, w: (Cout, Cin),
    bias_n: (N, Cout) f32  ->  (N, Cout, HW_pad) in x_flat.dtype."""
    N, Cin, HW_pad = x_flat.shape
    Cout = w.shape[0]
    assert HW_pad % 128 == 0
    itemsize = x_flat.dtype.itemsize
    w_bytes = w.size * w.dtype.itemsize

    vmem_limit = _vmem_limit_bytes()
    Nb, hw_tile = _pick_tiles(N, Cin, Cout, HW_pad, itemsize,
                              w_bytes=w_bytes, vmem_limit=vmem_limit)
    n_hw = pl.cdiv(HW_pad, hw_tile)

    bias3 = bias_n.reshape(N, Cout, 1).astype(jnp.float32)

    cost = pl.CostEstimate(
        flops=2 * N * Cout * Cin * HW_pad,
        transcendentals=0,
        bytes_accessed=(x_flat.size * itemsize
                        + N * Cout * HW_pad * itemsize
                        + w_bytes + bias3.size * 4),
    )

    return pl.pallas_call(
        _conv1x1_kernel,
        out_shape=jax.ShapeDtypeStruct((N, Cout, HW_pad), x_flat.dtype),
        grid_spec=pltpu.PrefetchScalarGridSpec(
            num_scalar_prefetch=0,
            grid=(N // Nb, n_hw),
            in_specs=[
                pl.BlockSpec((Nb, Cin, hw_tile), lambda n, t: (n, 0, t)),
                pl.BlockSpec((Cout, Cin), lambda n, t: (0, 0)),
                pl.BlockSpec((Nb, Cout, 1), lambda n, t: (n, 0, 0)),
            ],
            out_specs=pl.BlockSpec((Nb, Cout, hw_tile), lambda n, t: (n, 0, t)),
        ),
        compiler_params=pltpu.CompilerParams(
            dimension_semantics=("parallel", "parallel"),
            vmem_limit_bytes=vmem_limit,
        ),
        cost_estimate=cost,
    )(x_flat, w, bias3)


# --------------------------------------------------------------------------
# FusionModule.forward
# --------------------------------------------------------------------------
def fusion_forward(x_nchw, condition, w, b, *, if_fusion=True):
    """FusionModule.forward with net = Conv2d(kernel_size=1).

    x_nchw:    (N, Cx, H, W)
    condition: (N, Cc)
    w:         (Cout, Cin_net)  — PyTorch conv weight[:, :, 0, 0];
               Cin_net = Cx + Cc when if_fusion, else Cin_net = Cx.
    b:         (Cout,)
    """
    N, Cx, H, W = x_nchw.shape
    Cout, Cin_net = w.shape
    HW = H * W
    dt = x_nchw.dtype

    if if_fusion:
        Cc = condition.shape[1]
        assert Cin_net == Cx + Cc, "fused net must have Cx + Cc input channels"
        wx = w[:, :Cx]                              # (Cout, Cx) image-channel weights
        wc = w[:, Cx:]                              # (Cout, Cc) condition-channel weights
        # condition contribution is pixel-independent: fold into a per-n f32 bias
        bias_n = (condition.astype(jnp.float32) @ wc.T.astype(jnp.float32)
                  + b.astype(jnp.float32))          # (N, Cout)
    else:
        assert Cin_net == Cx, "non-fused net must have Cx input channels"
        wx = w
        bias_n = jnp.broadcast_to(b.astype(jnp.float32), (N, Cout))

    x_flat = x_nchw.reshape(N, Cx, HW)              # pure reshape, no transpose
    # pad HW up to a multiple of 128 -> lane-dense unmasked stores in the kernel
    HW_pad = pl.cdiv(HW, 128) * 128
    if HW_pad != HW:
        x_flat = jnp.pad(x_flat, ((0, 0), (0, 0), (0, HW_pad - HW)))

    out_flat = _conv1x1_nchw(x_flat, wx.astype(dt), bias_n)
    if HW_pad != HW:
        out_flat = out_flat[:, :, :HW]
    return out_flat.reshape(N, Cout, H, W)          # pure reshape, no transpose


# --------------------------------------------------------------------------
# Self-test
# --------------------------------------------------------------------------
if __name__ == "__main__":
    N, Cx, Cc, H, W, Cout = 2, 4, 4, 16, 16, 8

    key = jax.random.PRNGKey(0)
    kx, kc, kw, kb, kw2, kx2 = jax.random.split(key, 6)

    x = jax.random.normal(kx, (N, Cx, H, W), dtype=jnp.float32)
    condition = jax.random.normal(kc, (N, Cc), dtype=jnp.float32)

    # fused net: 1x1 conv over (Cx + Cc) channels, PyTorch weight[:, :, 0, 0] layout
    w_fused = jax.random.normal(kw, (Cout, Cx + Cc), dtype=jnp.float32) * 0.1
    b = jax.random.normal(kb, (Cout,), dtype=jnp.float32) * 0.1

    # --- if_fusion=True path (HW multiple of 128) ---
    out = jax.block_until_ready(fusion_forward(x, condition, w_fused, b, if_fusion=True))
    cond_map = jnp.broadcast_to(condition[:, :, None, None], (N, Cc, H, W))
    inp = jnp.concatenate([x, cond_map], axis=1)
    ref = jnp.einsum("nihw,oi->nohw", inp, w_fused) + b[None, :, None, None]
    assert out.shape == (N, Cout, H, W)
    assert jnp.allclose(out, ref, atol=1e-4, rtol=1e-4)

    # --- if_fusion=True path, small 7x7 feature map (HW=49 -> padded to 128) ---
    x2 = jax.random.normal(kx2, (N, Cx, 7, 7), dtype=jnp.float32)
    out2 = jax.block_until_ready(fusion_forward(x2, condition, w_fused, b, if_fusion=True))
    cond_map2 = jnp.broadcast_to(condition[:, :, None, None], (N, Cc, 7, 7))
    inp2 = jnp.concatenate([x2, cond_map2], axis=1)
    ref2 = jnp.einsum("nihw,oi->nohw", inp2, w_fused) + b[None, :, None, None]
    assert jnp.allclose(out2, ref2, atol=1e-4, rtol=1e-4)

    # --- if_fusion=False path: net(x) with a Conv2d(Cx, Cout, 1) ---
    w_plain = jax.random.normal(kw2, (Cout, Cx), dtype=jnp.float32) * 0.1
    out_nf = jax.block_until_ready(fusion_forward(x, condition, w_plain, b, if_fusion=False))
    ref_nf = jnp.einsum("nihw,oi->nohw", x, w_plain) + b[None, :, None, None]
    assert jnp.allclose(out_nf, ref_nf, atol=1e-4, rtol=1e-4)

    print("KERNEL_OK")
</pallas_src>

<mosaic_0001>
module attributes {stable_mosaic.version = 11 : i64} {
  func.func @_conv1x1_kernel(%arg0: i32, %arg1: i32, %arg2: memref<1x4x256xf32, #tpu.memory_space<vmem>>, %arg3: memref<8x4xf32, #tpu.memory_space<vmem>>, %arg4: memref<1x8x1xf32, #tpu.memory_space<vmem>>, %arg5: memref<1x8x256xf32, #tpu.memory_space<vmem>>) attributes {dimension_semantics = [#tpu.dimension_semantics<parallel>, #tpu.dimension_semantics<parallel>], iteration_bounds = array<i64: 2, 1>, scalar_prefetch = 0 : i64, scratch_operands = 0 : i64, tpu.core_type = #tpu.core_type<tc>, window_params = [{transform_indices = @transform_0, window_bounds = array<i64: 1, 4, 256>}, {pipeline_mode = #tpu.pipeline_mode<synchronous>, transform_indices = @transform_1, window_bounds = array<i64: 8, 4>}, {transform_indices = @transform_2, window_bounds = array<i64: 1, 8, 1>}, {transform_indices = @transform_3, window_bounds = array<i64: 1, 8, 256>}]} {
    %c0 = arith.constant 0 : index
    %c0_0 = arith.constant 0 : index
    %0 = vector.load %arg3[%c0, %c0_0] : memref<8x4xf32, #tpu.memory_space<vmem>>, vector<8x4xf32>
    %c0_1 = arith.constant 0 : index
    %c0_2 = arith.constant 0 : index
    %c0_3 = arith.constant 0 : index
    %1 = vector.load %arg2[%c0_1, %c0_2, %c0_3] : memref<1x4x256xf32, #tpu.memory_space<vmem>>, vector<1x4x256xf32>
    %2 = vector.shape_cast %1 : vector<1x4x256xf32> to vector<4x256xf32>
    %cst = arith.constant dense<0.000000e+00> : vector<8x256xf32>
    %3 = tpu.matmul %0, %2, %cst {dimension_numbers = #tpu.dot_dimension_numbers<[1], [0], [0], [1], [0, 0, 1, 1], [], []>} : vector<8x4xf32>, vector<4x256xf32>, vector<8x256xf32> -> vector<8x256xf32>
    %c0_4 = arith.constant 0 : index
    %c0_5 = arith.constant 0 : index
    %c0_6 = arith.constant 0 : index
    %4 = vector.load %arg4[%c0_4, %c0_5, %c0_6] : memref<1x8x1xf32, #tpu.memory_space<vmem>>, vector<1x8x1xf32>
    %5 = vector.shape_cast %4 : vector<1x8x1xf32> to vector<8x1xf32>
    %6 = vector.broadcast %5 : vector<8x1xf32> to vector<8x256xf32>
    %7 = arith.addf %3, %6 : vector<8x256xf32>
    %c0_7 = arith.constant 0 : index
    %c0_8 = arith.constant 0 : index
    %c0_9 = arith.constant 0 : index
    %8 = vector.load %arg5[%c0_7, %c0_8, %c0_9] : memref<1x8x256xf32, #tpu.memory_space<vmem>>, vector<1x8x256xf32>
    %9 = vector.shape_cast %8 : vector<1x8x256xf32> to vector<8x256xf32>
    %10 = vector.shape_cast %7 : vector<8x256xf32> to vector<1x8x256xf32>
    tpu.vector_store %arg5[%c0_7, %c0_8, %c0_9], %10 {strides = array<i32>} : memref<1x8x256xf32, #tpu.memory_space<vmem>>, vector<1x8x256xf32>,
    return
  }
  func.func @transform_0(%arg0: i32, %arg1: i32) -> (i32, i32, i32) {
    %c0_i32 = arith.constant 0 : i32
    %c0_i32_0 = arith.constant 0 : i32
    return %arg0, %c0_i32, %arg1 : i32, i32, i32
  }
  func.func @transform_1(%arg0: i32, %arg1: i32) -> (i32, i32) {
    %c0_i32 = arith.constant 0 : i32
    %c0_i32_0 = arith.constant 0 : i32
    %c0_i32_1 = arith.constant 0 : i32
    return %c0_i32, %c0_i32_0 : i32, i32
  }
  func.func @transform_2(%arg0: i32, %arg1: i32) -> (i32, i32, i32) {
    %c0_i32 = arith.constant 0 : i32
    %c0_i32_0 = arith.constant 0 : i32
    %c0_i32_1 = arith.constant 0 : i32
    return %arg0, %c0_i32, %c0_i32_0 : i32, i32, i32
  }
  func.func @transform_3(%arg0: i32, %arg1: i32) -> (i32, i32, i32) {
    %c0_i32 = arith.constant 0 : i32
    %c0_i32_0 = arith.constant 0 : i32
    return %arg0, %c0_i32, %arg1 : i32, i32, i32
  }
}

</mosaic_0001>

<bundles_post_ra>
// kernel: tpu_custom_call.1
= control target key start
LH: loop header
LB: loop body
LE: loop exit
PB: predicated region body
PF: predicated region fallthrough
CT: control target
= control target key end

     0   :  { %8 = vsyncpa [#allocation3], 0  ;;  %s713_s0 = inlined_call_operand.vmem [shape: f32[2,4,256], index: 0, kind: input, shape index: {}]   ;;  %s714_s1 = inlined_call_operand.vmem [shape: f32[8,4], index: 1, kind: input, shape index: {}]   ;;  %s715_s2 = inlined_call_operand.vmem [shape: f32[2,8,1], index: 2, kind: input, shape index: {}]   ;;  %s716_s3 = inlined_call_operand.hbm [shape: f32[2,8,256], index: 3, kind: output, shape index: {}]  }
   0x1   :  { %10 = vsyncpa [#allocation3 + $0x1], 0  ;;  %s595_s12 = smov 0   ;;  %s597_s13 = smov 0  }
   0x2   :  { %s599_s14 = smov 0   ;;  %s601_s15 = smov 0  }
   0x3   :  { %s603_s16 = smov 0   ;;  %s605_s17 = smov 0  }
   0x4 LB: > { %s414_s18 = sadd.s32 4294967295, %s570_s17   ;;  %s415_s19 = sadd.s32 4294967294, %s570_s17   ;;  %s570_s17 = sphi %s605_s17, %s16_s17   ;;  %s566_s16 = sphi %s603_s16, %s723_s16   ;;  %s562_s15 = sphi %s601_s15, %s722_s15   ;;  %s558_s14 = sphi %s599_s14, %s721_s14   ;;  %s554_s13 = sphi %s597_s13, %s720_s13   ;;  %s550_s12 = sphi %s595_s12, %s719_s12  }
   0x5   : > { %s28_s20 = sadd.s32 1, %s566_s16  ;;  %s112_s21 = sadd.s32 1, %s558_s14 }
   0x6   : > { %p30_p0 = scmp.ge.s32.totalorder %s28_s20, 2  ;;  %p122_p1 = scmp.ne.s32.totalorder %s558_s14, %s554_s13 }
   0x7   : > { %p123_p2 = scmp.eq.s32.totalorder %s414_s18, 1  ;;  %p128_p3 = scmp.ne.s32.totalorder %s554_s13, %s550_s12 }
   0x8   : > { %s725_s20 = smov (%p30_p0, %s28_s20), 0  ;;  %p129_p5 = scmp.eq.s32.totalorder %s415_s19, 1 }
   0x9   : > { %p635_p4 = por %p123_p2, %p122_p1  ;;  %s107_s23 = ssub.s32 %s566_s16, %s725_s20 }
   0xa   : > { %p418_p6 = scmp.ge.s32.totalorder %s570_s17, 1  ;;  %p110_p7 = scmp.eq.s32.totalorder %s107_s23, 0 }
   0xb   : > { %p642_p8 = por %p129_p5, %p128_p3  ;;  %p170_p9 = scmp.lt.s32.totalorder %s570_s17, 3 }
   0xc   : > { %s648_s25 = scalar_select %p110_p7, %s558_s14, %s112_s21  }
   0xd   : > { %p171_p10 = pnand %p418_p6, %p170_p9 }
   0xe   : > { %p203_p11 = scmp.lt.s32.totalorder (!%p171_p10), %s562_s15, 1  ;;  %v572_v0 = vmov (!%p171_p10), 0.0   ;;  %v573_v1 = vmov (!%p171_p10), 0   ;;  %vm231_vm0 = vcmask (!%p171_p10), 1043456   ;;  %v217_v5 = vld [vmem:[%s714_s1] sm:$0xff] (!%p171_p10)  ;;  %vm227_vm1 = vcmask (!%p171_p10), 31744  }
   0xf   : > { %174 = sbr.rel (%p171_p10) target bundleno = 260 (0x104), region = 32  ;;  %300 = vmatprep.mubr.f32.mxu0 (!%p171_p10), %v572_v0  ;;  %490 = vset.pattern.permute.xlu0 (!%p171_p10), %v573_v1  ;;  %s199_s9 = sand.u32 (!%p171_p10), 1, %s554_s13  }
  0x10   : > { %s419_s10 = sshll.u32 (!%p171_p10), %s199_s9, 4  ;;  %s432_s11 = sshll.u32 (!%p171_p10), %s562_s15, 8 }
  0x11   : > { %s201_s18 = scalar_lea.vmem (!%p171_p10), [#allocation2], %s419_s10  ;;  %s574_s28 = smov (!%p171_p10), [#allocation2]  }
  0x12   : > { %s326_s19 = sshll.u32 (!%p171_p10), %s201_s18, 4  ;;  %s496_s29 = sshll.u32 (!%p171_p10), %s574_s28, 4  ;;  %s668_s19 = int_to_ptr.vmem [resolvable:$true] %s326_s19  ;;  %s497_s29 = int_to_ptr.vmem [resolvable:$false] %s496_s29 }
  0x13   : > { %p499_p1 = scmp.lt.s32.totalorder (!%p171_p10), %s668_s19, %s497_s29 }
  0x16   : > { %s204_s26 = scalar_select %p203_p11, %s562_s15, 1 }
  0x17   : > { %s492_s15 = scalar_lea.vmem %s668_s19, 256 }
  0x18   : > { %s431_s27 = sshll.u32 %s204_s26, 3  ;;  %s666_s26 = scalar_lea.hbm %s716_s3, %s432_s11 }
  0x19   : > { %s210_s30 = scalar_lea.vmem %s713_s0, %s431_s27  ;;  %s215_s6 = scalar_lea.vmem %s715_s2, %s431_s27 }
  0x1a   : > { %v218_v2 = vld [vmem:[%s210_s30] sm:$0xff]  ;;  %s310_s27 = scalar_lea.sflag [#allocation3], %s199_s9  ;;  %p493_p12 = scmp.ne.s32.totalorder %s668_s19, %s492_s15 }
  0x1b   : > { %v219_v3 = vld [vmem:[%s215_s6] sm:$0xff]  ;;  %v226_v4 = vcombine.high %v218_v2, %v218_v2  ;;  %s498_s30 = scalar_lea.vmem %s497_s29, 512 }
  0x1c   : > { %222 = vperm.xlu0 %490, %v219_v3   ;;  %p494_p13 = pnand %p493_p12, %p635_p4  ;;  %p500_p2 = scmp.lt.s32.totalorder %s498_s30, %s492_s15 }
  0x1d   : > { %423 = vmatprep.subr.msk.mxu0 %vm231_vm0, %v226_v4 }
  0x1e   : > { %424 = vmatpush1.msk.msra.mxu0 %vm231_vm0, %v218_v2  ;;  %p495_p0 = pneg %p494_p13  ;;  %p501_p3 = por %p500_p2, %p499_p1 }
  0x1f   : > { %425 = vmatmul.mubr.msk.f32.vlgmr.msra.gmra.mrb[0].mxu0 %vm227_vm1, %v217_v5 }
  0x20   : > { %p502_p5 = pnand %p501_p3, %p495_p0 }
  0x9b   : > { %v223_v6 = vpop.permute.xlu0 %222 }
  0xf2   : > { %v302_v7 = vpop.f32.mrb[0].mxu0 }
  0xf3   : > { %v303_v8 = vadd.f32 %v302_v7, %v223_v6  ;;  %v304_v9 = vpop.f32.mrb[1].mxu0 }
  0xf4   : > { %v305_v10 = vadd.f32 %v304_v9, %v223_v6 }
  0xf5   : > { %307 = vst [vmem:[%s201_s18] sm:$0xff] %v303_v8 }
  0xf6   : > { %308 = vst [vmem:[%s201_s18 + $0x8] sm:$0xff] %v305_v10 }
  0xf7   : > { %505 = shalt.err (!%p502_p5)
}
  0xf8   : > { %s506_s4 = scalar_lea.hbm %s666_s26, 256  ;;  %s510_s7 = scalar_lea.hbm %s716_s3, 512 }
  0xf9   : > { %p507_p6 = scmp.ne.s32.totalorder %s666_s26, %s506_s4  ;;  %p511_p10 = scmp.lt.u32.totalorder %s666_s26, %s716_s3 }
  0xfa   : > { %p512_p11 = scmp.lt.u32.totalorder %s510_s7, %s506_s4  ;;  %p514_p13 = scmp.lt.u32.totalorder %s506_s4, %s666_s26 }
  0xfb   : > { %p508_p7 = pnand %p507_p6, %p635_p4 }
  0xfc   : > { %p513_p12 = por %p512_p11, %p511_p10 }
  0xfd   : > { %p509_p9 = pneg %p508_p7 }
  0xfe   : > { %p515_p0 = por %p514_p13, %p513_p12 }
 0x100   : > { %p516_p1 = pnand %p515_p0, %p509_p9 }
 0x102   : > { %519 = shalt.err (!%p516_p1)
}
 0x103   : > { %433 = dma.vmem_to_hbm [thread:$0]  (%p635_p4), %s668_s19, 256, %s666_s26, %s310_s27  }
 0x104 PF: > { %p439_p2 = scmp.ge.s32.totalorder %s570_s17, 2  ;;  %s338_s10 = sand.u32 1, %s550_s12  }
 0x105   : > { %s339_s11 = scalar_lea.sflag [#allocation3], %s338_s10 }
 0x106   : > { %p436_p3 = pnand %p439_p2, %p642_p8 }
 0x108   : > { %545 = dma.done.wait (!%p436_p3), %s339_s11, 256  }
 0x109   : > { %547 = vsyncadd (!%p436_p3), %s339_s11, 4294967040  ;;  %s16_s17 = sadd.s32 1, %s570_s17   ;;  %s719_s12 = smov %s554_s13 }
 0x10a   : > { %p13_p5 = scmp.ge.s32.totalorder %s16_s17, 4   ;;  %s720_s13 = smov %s558_s14 }
 0x10b   : > { %s721_s14 = smov %s648_s25  ;;  %s722_s15 = smov %s566_s16 }
 0x10c   : > { %s723_s16 = smov %s725_s20  ;;  %15 = sbr.rel (!%p13_p5) target bundleno = 4 (0x4), region = 70 }
 0x113   :  { %344 = vsyncpa [#allocation3], 1 }
 0x114   :  { %346 = vsyncpa [#allocation3 + $0x1], 1 }

</bundles_post_ra>
